<compile_context>
chip_gen: v7x
topology: tpu7x:2x2x1
jax: 0.10.0
libtpu: 0.0.40
codegen_flags: <defaults>
</compile_context>

<pallas_src>
import functools

import jax
import jax.numpy as jnp
from jax.experimental import pallas as pl
from jax.experimental.pallas import tpu as pltpu


# VGG19 (no BN) features[:35]  == feature_layer=34  (conv5_4 output, NO final ReLU).
# Entries: ("conv", Cin, Cout, apply_relu) or ("pool",).  ReLUs are fused into convs.
VGG19_FEATURES_34 = (
    ("conv", 3, 64, True), ("conv", 64, 64, True), ("pool",),
    ("conv", 64, 128, True), ("conv", 128, 128, True), ("pool",),
    ("conv", 128, 256, True), ("conv", 256, 256, True),
    ("conv", 256, 256, True), ("conv", 256, 256, True), ("pool",),
    ("conv", 256, 512, True), ("conv", 512, 512, True),
    ("conv", 512, 512, True), ("conv", 512, 512, True), ("pool",),
    ("conv", 512, 512, True), ("conv", 512, 512, True),
    ("conv", 512, 512, True), ("conv", 512, 512, False),
)

IMAGENET_MEAN = (0.485, 0.456, 0.406)
IMAGENET_STD = (0.229, 0.224, 0.225)


# ----------------------------- Pallas kernels ------------------------------------


def _prenorm_kernel(x_ref, scale_ref, shift_ref, o_ref, *, k):
    # x: (1, H, W, 3) f32; scale/shift: (1, 1, 1, 3) f32; out: bf16
    # reference: clamp(x * 255/rgb_range, 0, 255) / rgb_range, then (. - mean) / std,
    # folded into: clamp(x * k, 0, 255) * scale + shift   (no divides in-kernel).
    c = jnp.clip(x_ref[...] * k, 0.0, 255.0)
    o_ref[...] = (c * scale_ref[...] + shift_ref[...]).astype(o_ref.dtype)


def _conv3x3_kernel(x_ref, w_ref, b_ref, o_ref, xp_ref, *, H, W, apply_relu):
    # x_ref : (1, H, W, Cin)  bf16  (un-padded input tile for one batch element)
    # w_ref : (9, Cin, Cout)  bf16  (flattened 3x3 taps, tap t = 3*dy + dx)
    # b_ref : (1, Cout)       f32
    # o_ref : (1, H, W, Cout)
    # xp_ref: ((H+2)*(W+2)+8, Cin) bf16 VMEM scratch -- zero-padded input, spatially
    #         flattened row-major so every tap is ONE contiguous (H*(W+2), Cin) slab.
    Wp = W + 2            # padded width
    M = H * Wp            # width-padded flattened output rows (junk cols discarded)
    Cout = b_ref.shape[-1]

    # Build the zero halo in VMEM (no HBM jnp.pad round trip).
    xp_ref[...] = jnp.zeros_like(xp_ref)
    for h in range(H):
        xp_ref[pl.ds((h + 1) * Wp + 1, W), :] = x_ref[0, h]

    # Bias-initialised f32 accumulator; 9 accumulating bf16 matmuls on the MXU.
    acc = jnp.broadcast_to(b_ref[...], (M, Cout)).astype(jnp.float32)
    for dy in range(3):
        for dx in range(3):
            t = 3 * dy + dx
            acc = acc + jnp.dot(
                xp_ref[pl.ds(dy * Wp + dx, M), :],
                w_ref[t],
                preferred_element_type=jnp.float32,
            )
    if apply_relu:
        acc = jnp.maximum(acc, 0.0)

    # Store the W valid columns of each output row (junk padding columns dropped).
    for h in range(H):
        o_ref[0, h] = acc[h * Wp:h * Wp + W, :].astype(o_ref.dtype)


def _maxpool2_kernel(x_ref, s0_ref, s1_ref, o_ref):
    # x_ref : (1, 2, W, C)   -- one pair of input rows (rows 2i, 2i+1)
    # s0/s1 : (Wo, W)        -- exact 0/1 selection matrices for even / odd columns
    # o_ref : (1, 1, Wo, C)
    y = jnp.maximum(x_ref[0, 0], x_ref[0, 1])                        # (W, C)
    even = jnp.dot(s0_ref[...], y, preferred_element_type=jnp.float32)
    odd = jnp.dot(s1_ref[...], y, preferred_element_type=jnp.float32)
    o_ref[0, 0] = jnp.maximum(even, odd).astype(o_ref.dtype)


# ----------------------------- pallas_call wrappers -------------------------------


@functools.lru_cache(maxsize=None)
def _make_prenorm(N, H, W, rgb_range):
    kernel = functools.partial(_prenorm_kernel, k=255.0 / rgb_range)
    return jax.jit(
        pl.pallas_call(
            kernel,
            out_shape=jax.ShapeDtypeStruct((N, H, W, 3), jnp.bfloat16),
            grid=(N,),
            in_specs=[
                pl.BlockSpec((1, H, W, 3), lambda n: (n, 0, 0, 0)),
                pl.BlockSpec((1, 1, 1, 3), lambda n: (0, 0, 0, 0)),
                pl.BlockSpec((1, 1, 1, 3), lambda n: (0, 0, 0, 0)),
            ],
            out_specs=pl.BlockSpec((1, H, W, 3), lambda n: (n, 0, 0, 0)),
            compiler_params=pltpu.CompilerParams(
                dimension_semantics=("parallel",)),
        )
    )


@functools.lru_cache(maxsize=None)
def _make_conv3x3(N, H, W, Cin, Cout, apply_relu, out_dtype):
    Wp = W + 2
    # +8 rows of slack so the shifted tap loads (max start 2*Wp+2) stay in bounds;
    # those rows only feed the discarded width-padding columns.
    Mp = (H + 2) * Wp + 8
    kernel = functools.partial(_conv3x3_kernel, H=H, W=W, apply_relu=apply_relu)
    out_itemsize = jax.ShapeDtypeStruct((), out_dtype).dtype.itemsize
    flops = 2 * N * H * W * 9 * Cin * Cout
    bytes_accessed = (N * H * W * Cin * 2            # bf16 activations in
                      + 9 * Cin * Cout * 2           # bf16 weights
                      + Cout * 4                     # f32 bias
                      + N * H * W * Cout * out_itemsize)
    return jax.jit(
        pl.pallas_call(
            kernel,
            out_shape=jax.ShapeDtypeStruct((N, H, W, Cout), out_dtype),
            grid=(N,),
            in_specs=[
                pl.BlockSpec((1, H, W, Cin), lambda n: (n, 0, 0, 0)),
                pl.BlockSpec((9, Cin, Cout), lambda n: (0, 0, 0)),
                pl.BlockSpec((1, Cout), lambda n: (0, 0)),
            ],
            out_specs=pl.BlockSpec((1, H, W, Cout), lambda n: (n, 0, 0, 0)),
            scratch_shapes=[pltpu.VMEM((Mp, Cin), jnp.bfloat16)],
            compiler_params=pltpu.CompilerParams(
                dimension_semantics=("parallel",)),
            cost_estimate=pl.CostEstimate(
                flops=flops, transcendentals=0, bytes_accessed=bytes_accessed),
        )
    )


@functools.lru_cache(maxsize=None)
def _make_maxpool2(N, H, W, C, dtype):
    Ho, Wo = H // 2, W // 2
    return jax.jit(
        pl.pallas_call(
            _maxpool2_kernel,
            out_shape=jax.ShapeDtypeStruct((N, Ho, Wo, C), dtype),
            grid=(N, Ho),
            in_specs=[
                pl.BlockSpec((1, 2, W, C), lambda n, i: (n, i, 0, 0)),
                pl.BlockSpec((Wo, W), lambda n, i: (0, 0)),
                pl.BlockSpec((Wo, W), lambda n, i: (0, 0)),
            ],
            out_specs=pl.BlockSpec((1, 1, Wo, C), lambda n, i: (n, i, 0, 0)),
            compiler_params=pltpu.CompilerParams(
                dimension_semantics=("parallel", "parallel")),
        )
    )


def prenorm(x_nhwc, scale, shift, rgb_range):
    N, H, W, _ = x_nhwc.shape
    return _make_prenorm(N, H, W, float(rgb_range))(x_nhwc, scale, shift)


def conv3x3(x_nhwc, w9, b, apply_relu, out_dtype):
    N, H, W, Cin = x_nhwc.shape
    Cout = w9.shape[-1]
    return _make_conv3x3(N, H, W, Cin, Cout, bool(apply_relu), out_dtype)(
        x_nhwc, w9, b)


def maxpool2(x_nhwc):
    N, H, W, C = x_nhwc.shape
    Wo = W // 2
    cols = jnp.arange(W)[None, :]
    even = jnp.arange(Wo)[:, None] * 2
    s0 = (cols == even).astype(x_nhwc.dtype)        # picks columns 0, 2, 4, ...
    s1 = (cols == even + 1).astype(x_nhwc.dtype)    # picks columns 1, 3, 5, ...
    return _make_maxpool2(N, H, W, C, x_nhwc.dtype)(x_nhwc, s0, s1)


# ----------------------------- parameters & forward -------------------------------


def init_vgg_params(key):
    """Deterministic He-style init for all conv layers (synthetic stand-in for the
    pretrained vgg19 checkpoint).  Weights stored as bf16 (9, Cin, Cout)."""
    params = []
    for idx, spec in enumerate(VGG19_FEATURES_34):
        if spec[0] == "conv":
            _, cin, cout, _ = spec
            kw = jax.random.fold_in(key, idx)
            w = jax.random.normal(kw, (3, 3, cin, cout), jnp.float32) * (
                (2.0 / (9.0 * cin)) ** 0.5)
            w9 = w.reshape(9, cin, cout).astype(jnp.bfloat16)
            b = jnp.zeros((1, cout), jnp.float32)
            params.append((w9, b))
        else:
            params.append(None)
    return params


def vgg_feature_extractor(x_nchw, rgb_range, params, use_input_norm=True):
    """Forward pass matching VGGFeatureExtractor.forward (PyTorch NCHW in / NCHW out)."""
    x = jnp.transpose(x_nchw, (0, 2, 3, 1)).astype(jnp.float32)  # NCHW -> NHWC
    mean = jnp.asarray(IMAGENET_MEAN, jnp.float32)
    std = jnp.asarray(IMAGENET_STD, jnp.float32)
    if use_input_norm:
        scale = (1.0 / (rgb_range * std)).reshape(1, 1, 1, 3)
        shift = (-mean / std).reshape(1, 1, 1, 3)
    else:
        # still apply the mul/clamp/div part of forward()
        scale = jnp.full((1, 1, 1, 3), 1.0 / rgb_range, jnp.float32)
        shift = jnp.zeros((1, 1, 1, 3), jnp.float32)
    x = prenorm(x, scale, shift, rgb_range)          # -> bf16 NHWC

    last_conv = max(i for i, s in enumerate(VGG19_FEATURES_34) if s[0] == "conv")
    for i, (spec, p) in enumerate(zip(VGG19_FEATURES_34, params)):
        if spec[0] == "conv":
            _, _, _, apply_relu = spec
            out_dtype = jnp.float32 if i == last_conv else jnp.bfloat16
            x = conv3x3(x, p[0], p[1], apply_relu, out_dtype)
        else:
            x = maxpool2(x)

    return jnp.transpose(x, (0, 3, 1, 2)).astype(jnp.float32)  # NHWC -> NCHW


# ----------------------------------- main ------------------------------------------

if __name__ == "__main__":
    key = jax.random.PRNGKey(0)
    k_x, k_p = jax.random.split(key)

    # Small, shape-consistent example: batch=2, 3 input channels, 16x16 spatial.
    x = jax.random.uniform(k_x, (2, 3, 16, 16), jnp.float32, 0.0, 255.0)
    rgb_range = 255.0

    params = init_vgg_params(k_p)

    out = vgg_feature_extractor(x, rgb_range, params)
    out = jax.block_until_ready(out)

    # VGG19 conv5_4 feature: 512 channels, spatial reduced by 4 max-pools (16 -> 1).
    assert out.shape == (2, 512, 1, 1), out.shape
    assert bool(jnp.all(jnp.isfinite(out)))

    print("KERNEL_OK")
</pallas_src>

<mosaic_0001>
module attributes {stable_mosaic.version = 11 : i64} {
  func.func @_prenorm_kernel(%arg0: i32, %arg1: memref<1x16x16x3xf32, #tpu.memory_space<vmem>>, %arg2: memref<1x1x1x3xf32, #tpu.memory_space<vmem>>, %arg3: memref<1x1x1x3xf32, #tpu.memory_space<vmem>>, %arg4: memref<1x16x16x3xbf16, #tpu.memory_space<vmem>>) attributes {dimension_semantics = [#tpu.dimension_semantics<parallel>], iteration_bounds = array<i64: 2>, scalar_prefetch = 0 : i64, scratch_operands = 0 : i64, tpu.core_type = #tpu.core_type<tc>, window_params = [{transform_indices = @transform_0, window_bounds = array<i64: 1, 16, 16, 3>}, {pipeline_mode = #tpu.pipeline_mode<synchronous>, transform_indices = @transform_1, window_bounds = array<i64: 1, 1, 1, 3>}, {pipeline_mode = #tpu.pipeline_mode<synchronous>, transform_indices = @transform_2, window_bounds = array<i64: 1, 1, 1, 3>}, {transform_indices = @transform_3, window_bounds = array<i64: 1, 16, 16, 3>}]} {
    %c0 = arith.constant 0 : index
    %c0_0 = arith.constant 0 : index
    %c0_1 = arith.constant 0 : index
    %c0_2 = arith.constant 0 : index
    %0 = vector.load %arg1[%c0, %c0_0, %c0_1, %c0_2] : memref<1x16x16x3xf32, #tpu.memory_space<vmem>>, vector<1x16x16x3xf32>
    %cst = arith.constant 1.000000e+00 : f32
    %1 = vector.broadcast %cst : f32 to vector<1x16x16x3xf32>
    %2 = arith.mulf %0, %1 : vector<1x16x16x3xf32>
    %cst_3 = arith.constant 0.000000e+00 : f32
    %cst_4 = arith.constant 2.550000e+02 : f32
    %3 = vector.broadcast %cst_3 : f32 to vector<1x16x16x3xf32>
    %4 = arith.maximumf %3, %2 : vector<1x16x16x3xf32>
    %5 = vector.broadcast %cst_4 : f32 to vector<1x16x16x3xf32>
    %6 = arith.minimumf %5, %4 : vector<1x16x16x3xf32>
    %c0_5 = arith.constant 0 : index
    %c0_6 = arith.constant 0 : index
    %c0_7 = arith.constant 0 : index
    %c0_8 = arith.constant 0 : index
    %7 = vector.load %arg2[%c0_5, %c0_6, %c0_7, %c0_8] : memref<1x1x1x3xf32, #tpu.memory_space<vmem>>, vector<1x1x1x3xf32>
    %8 = vector.broadcast %7 : vector<1x1x1x3xf32> to vector<1x16x16x3xf32>
    %9 = arith.mulf %6, %8 : vector<1x16x16x3xf32>
    %c0_9 = arith.constant 0 : index
    %c0_10 = arith.constant 0 : index
    %c0_11 = arith.constant 0 : index
    %c0_12 = arith.constant 0 : index
    %10 = vector.load %arg3[%c0_9, %c0_10, %c0_11, %c0_12] : memref<1x1x1x3xf32, #tpu.memory_space<vmem>>, vector<1x1x1x3xf32>
    %11 = vector.broadcast %10 : vector<1x1x1x3xf32> to vector<1x16x16x3xf32>
    %12 = arith.addf %9, %11 : vector<1x16x16x3xf32>
    %13 = arith.truncf %12 : vector<1x16x16x3xf32> to vector<1x16x16x3xbf16>
    %c0_13 = arith.constant 0 : index
    %c0_14 = arith.constant 0 : index
    %c0_15 = arith.constant 0 : index
    %c0_16 = arith.constant 0 : index
    %14 = vector.load %arg4[%c0_13, %c0_14, %c0_15, %c0_16] : memref<1x16x16x3xbf16, #tpu.memory_space<vmem>>, vector<1x16x16x3xbf16>
    tpu.vector_store %arg4[%c0_13, %c0_14, %c0_15, %c0_16], %13 {strides = array<i32>} : memref<1x16x16x3xbf16, #tpu.memory_space<vmem>>, vector<1x16x16x3xbf16>,
    return
  }
  func.func @transform_0(%arg0: i32) -> (i32, i32, i32, i32) {
    %c0_i32 = arith.constant 0 : i32
    %c0_i32_0 = arith.constant 0 : i32
    %c0_i32_1 = arith.constant 0 : i32
    %c0_i32_2 = arith.constant 0 : i32
    return %arg0, %c0_i32, %c0_i32_0, %c0_i32_1 : i32, i32, i32, i32
  }
  func.func @transform_1(%arg0: i32) -> (i32, i32, i32, i32) {
    %c0_i32 = arith.constant 0 : i32
    %c0_i32_0 = arith.constant 0 : i32
    %c0_i32_1 = arith.constant 0 : i32
    %c0_i32_2 = arith.constant 0 : i32
    %c0_i32_3 = arith.constant 0 : i32
    return %c0_i32, %c0_i32_0, %c0_i32_1, %c0_i32_2 : i32, i32, i32, i32
  }
  func.func @transform_2(%arg0: i32) -> (i32, i32, i32, i32) {
    %c0_i32 = arith.constant 0 : i32
    %c0_i32_0 = arith.constant 0 : i32
    %c0_i32_1 = arith.constant 0 : i32
    %c0_i32_2 = arith.constant 0 : i32
    %c0_i32_3 = arith.constant 0 : i32
    return %c0_i32, %c0_i32_0, %c0_i32_1, %c0_i32_2 : i32, i32, i32, i32
  }
  func.func @transform_3(%arg0: i32) -> (i32, i32, i32, i32) {
    %c0_i32 = arith.constant 0 : i32
    %c0_i32_0 = arith.constant 0 : i32
    %c0_i32_1 = arith.constant 0 : i32
    %c0_i32_2 = arith.constant 0 : i32
    return %arg0, %c0_i32, %c0_i32_0, %c0_i32_1 : i32, i32, i32, i32
  }
}

</mosaic_0001>

<bundles_post_ra>
// kernel: tpu_custom_call.1
= control target key start
LH: loop header
LB: loop body
LE: loop exit
PB: predicated region body
PF: predicated region fallthrough
CT: control target
= control target key end

     0   :  { %s676_s12 = smov 0   ;;  %s871_s0 = inlined_call_operand.vmem [shape: f32[2,16,16,3], index: 0, kind: input, shape index: {}]   ;;  %s872_s1 = inlined_call_operand.vmem [shape: f32[1,1,1,3], index: 1, kind: input, shape index: {}]   ;;  %s873_s2 = inlined_call_operand.vmem [shape: f32[1,1,1,3], index: 2, kind: input, shape index: {}]   ;;  %s874_s3 = inlined_call_operand.vmem [shape: bf16[2,16,16,3], index: 3, kind: output, shape index: {}]  }
   0x1 LB: > { %s561_s13 = sadd.s32 4294967295, %s654_s12   ;;  %p565_p0 = scmp.ge.s32.totalorder %s654_s12, 1  ;;  %s654_s12 = sphi %s676_s12, %s13_s12  }
   0x2   : > { %p137_p1 = scmp.lt.s32.totalorder %s654_s12, 3 }
   0x4   : > { %p138_p2 = pnand %p565_p0, %p137_p1 }
   0x5   : > { %p161_p3 = scmp.lt.s32.totalorder (!%p138_p2), %s561_s13, 1  ;;  %v696_v1 = vld [vmem:[%s872_s1] ss:$0 sm:$0xff] (!%p138_p2)  ;;  %vm473_vm0 = vcmask (!%p138_p2), 19456  }
   0x6   : > { %141 = sbr.rel (%p138_p2) target bundleno = 64 (0x40), region = 32  ;;  %v708_v19 = vld [vmem:[%s873_s2] ss:$0 sm:$0xff] (!%p138_p2) }
   0xd   : > { %s876_s13 = smov (!%p161_p3, %s561_s13), 1 }
   0xe   : > { %s606_s14 = sshll.u32 %s876_s13, 8  ;;  %s607_s22 = sshll.u32 %s876_s13, 7 }
   0xf   : > { %s690_s17 = scalar_lea.vmem %s871_s0, %s606_s14  ;;  %s724_s25 = scalar_lea.vmem %s874_s3, %s607_s22 }
  0x10   : > { %v171_v0 = vld [vmem:[%s690_s17] sm:$0xff]  ;;  %v172_v2 = vld [vmem:[%s690_s17 + $0x8] sm:$0xff]  ;;  %v173_v3 = vld [vmem:[%s690_s17 + $0x10] sm:$0xff] }
  0x11   : > { %v203_v4 = vmax.f32 %v171_v0, 0.0  ;;  %v204_v5 = vmax.f32 %v172_v2, 0.0  ;;  %v205_v6 = vmax.f32 %v173_v3, 0.0  ;;  %v174_v7 = vld [vmem:[%s690_s17 + $0x18] sm:$0xff]  ;;  %v175_v8 = vld [vmem:[%s690_s17 + $0x20] sm:$0xff]  ;;  %v176_v9 = vld [vmem:[%s690_s17 + $0x28] sm:$0xff] }
  0x12   : > { %v206_v10 = vmax.f32 %v174_v7, 0.0  ;;  %v207_v11 = vmax.f32 %v175_v8, 0.0  ;;  %v208_v12 = vmax.f32 %v176_v9, 0.0  ;;  %v177_v13 = vld [vmem:[%s690_s17 + $0x30] sm:$0xff]  ;;  %v178_v14 = vld [vmem:[%s690_s17 + $0x38] sm:$0xff]  ;;  %v179_v40 = vld [vmem:[%s690_s17 + $0x40] sm:$0xff] }
  0x13   : > { %v235_v15 = vmin.f32 %v203_v4, 255.0  ;;  %v236_v16 = vmin.f32 %v204_v5, 255.0  ;;  %v237_v17 = vmin.f32 %v205_v6, 255.0  ;;  %v209_v18 = vmax.f32 %v177_v13, 0.0  ;;  %v180_v41 = vld [vmem:[%s690_s17 + $0x48] sm:$0xff]  ;;  %v181_v42 = vld [vmem:[%s690_s17 + $0x50] sm:$0xff] }
  0x14   : > { %v238_v20 = vmin.f32 %v206_v10, 255.0  ;;  %v239_v21 = vmin.f32 %v207_v11, 255.0  ;;  %v240_v22 = vmin.f32 %v208_v12, 255.0  ;;  %v210_v23 = vmax.f32 %v178_v14, 0.0  ;;  %v182_v47 = vld [vmem:[%s690_s17 + $0x58] sm:$0xff]  ;;  %v183_v48 = vld [vmem:[%s690_s17 + $0x60] sm:$0xff] }
  0x15   : > { %v274_v24 = vmul.f32 %v696_v1, %v235_v15  ;;  %v275_v25 = vmul.f32 %v696_v1, %v236_v16  ;;  %v276_v26 = vmul.f32 %v696_v1, %v237_v17  ;;  %v241_v27 = vmin.f32 %v209_v18, 255.0  ;;  %v184_v49 = vld [vmem:[%s690_s17 + $0x68] sm:$0xff]  ;;  %v185_v54 = vld [vmem:[%s690_s17 + $0x70] sm:$0xff]  ;;  %v186_v59 = vld [vmem:[%s690_s17 + $0x78] sm:$0xff] }
  0x16   : > { %v277_v28 = vmul.f32 %v696_v1, %v238_v20  ;;  %v278_v29 = vmul.f32 %v696_v1, %v239_v21  ;;  %v279_v30 = vmul.f32 %v696_v1, %v240_v22  ;;  %v242_v31 = vmin.f32 %v210_v23, 255.0 }
  0x17   : > { %v313_v32 = vadd.f32 %v708_v19, %v274_v24  ;;  %v314_v33 = vadd.f32 %v708_v19, %v275_v25  ;;  %v315_v34 = vadd.f32 %v708_v19, %v276_v26  ;;  %v280_v35 = vmul.f32 %v696_v1, %v241_v27  ;;  %v187_v26 = vld [vmem:[%s690_s17 + $0x80] sm:$0xff]  ;;  %v188_v27 = vld [vmem:[%s690_s17 + $0x88] sm:$0xff] }
  0x18   : > { %v316_v36 = vadd.f32 %v708_v19, %v277_v28  ;;  %v317_v37 = vadd.f32 %v708_v19, %v278_v29  ;;  %v318_v38 = vadd.f32 %v708_v19, %v279_v30  ;;  %v281_v39 = vmul.f32 %v696_v1, %v242_v31  ;;  %v189_v28 = vld [vmem:[%s690_s17 + $0x90] sm:$0xff] }
  0x19   : > { %v608_v43 = vpack.c.bf16 %v313_v32, %v313_v32  ;;  %v609_v44 = vpack.c.bf16 %v314_v33, %v314_v33  ;;  %v610_v45 = vpack.c.bf16 %v315_v34, %v315_v34  ;;  %v319_v46 = vadd.f32 %v708_v19, %v280_v35  ;;  %v190_v33 = vld [vmem:[%s690_s17 + $0x98] sm:$0xff]  ;;  %v191_v34 = vld [vmem:[%s690_s17 + $0xa0] sm:$0xff]  ;;  %v192_v35 = vld [vmem:[%s690_s17 + $0xa8] sm:$0xff] }
  0x1a   : > { %v611_v50 = vpack.c.bf16 %v316_v36, %v316_v36  ;;  %v612_v51 = vpack.c.bf16 %v317_v37, %v317_v37  ;;  %v613_v52 = vpack.c.bf16 %v318_v38, %v318_v38  ;;  %v320_v53 = vadd.f32 %v708_v19, %v281_v39 }
  0x1b   : > { %474 = vst.msk [vmem:[%s724_s25] sm:$0xf] %vm473_vm0, %v608_v43  ;;  %475 = vst.msk [vmem:[%s724_s25 + $0x4] sm:$0xf] %vm473_vm0, %v609_v44  ;;  %v614_v55 = vpack.c.bf16 %v319_v46, %v319_v46  ;;  %v211_v56 = vmax.f32 %v179_v40, 0.0  ;;  %v212_v57 = vmax.f32 %v180_v41, 0.0 }
  0x1c   : > { %476 = vst.msk [vmem:[%s724_s25 + $0x8] sm:$0xf] %vm473_vm0, %v610_v45  ;;  %v213_v58 = vmax.f32 %v181_v42, 0.0  ;;  %477 = vst.msk [vmem:[%s724_s25 + $0xc] sm:$0xf] %vm473_vm0, %v611_v50  ;;  %v615_v60 = vpack.c.bf16 %v320_v53, %v320_v53  ;;  %v214_v61 = vmax.f32 %v182_v47, 0.0 }
  0x1d   : > { %478 = vst.msk [vmem:[%s724_s25 + $0x10] sm:$0xf] %vm473_vm0, %v612_v51  ;;  %479 = vst.msk [vmem:[%s724_s25 + $0x14] sm:$0xf] %vm473_vm0, %v613_v52  ;;  %v215_v62 = vmax.f32 %v183_v48, 0.0  ;;  %v216_v63 = vmax.f32 %v184_v49, 0.0 }
  0x1e   : > { %480 = vst.msk [vmem:[%s724_s25 + $0x18] sm:$0xf] %vm473_vm0, %v614_v55  ;;  %v243_v0 = vmin.f32 %v211_v56, 255.0  ;;  %v244_v2 = vmin.f32 %v212_v57, 255.0  ;;  %v245_v3 = vmin.f32 %v213_v58, 255.0  ;;  %v217_v4 = vmax.f32 %v185_v54, 0.0 }
  0x1f   : > { %481 = vst.msk [vmem:[%s724_s25 + $0x1c] sm:$0xf] %vm473_vm0, %v615_v60  ;;  %v246_v5 = vmin.f32 %v214_v61, 255.0  ;;  %v247_v6 = vmin.f32 %v215_v62, 255.0  ;;  %v248_v7 = vmin.f32 %v216_v63, 255.0  ;;  %v218_v8 = vmax.f32 %v186_v59, 0.0 }
  0x20   : > { %v282_v9 = vmul.f32 %v696_v1, %v243_v0  ;;  %v283_v10 = vmul.f32 %v696_v1, %v244_v2  ;;  %v284_v11 = vmul.f32 %v696_v1, %v245_v3  ;;  %v249_v12 = vmin.f32 %v217_v4, 255.0  ;;  %v193_v40 = vld [vmem:[%s690_s17 + $0xb0] sm:$0xff]  ;;  %v194_v45 = vld [vmem:[%s690_s17 + $0xb8] sm:$0xff] }
  0x21   : > { %v285_v13 = vmul.f32 %v696_v1, %v246_v5  ;;  %v286_v14 = vmul.f32 %v696_v1, %v247_v6  ;;  %v287_v15 = vmul.f32 %v696_v1, %v248_v7  ;;  %v250_v16 = vmin.f32 %v218_v8, 255.0 }
  0x22   : > { %v321_v17 = vadd.f32 %v708_v19, %v282_v9  ;;  %v322_v18 = vadd.f32 %v708_v19, %v283_v10  ;;  %v323_v20 = vadd.f32 %v708_v19, %v284_v11  ;;  %v288_v21 = vmul.f32 %v696_v1, %v249_v12  ;;  %v195_v11 = vld [vmem:[%s690_s17 + $0xc0] sm:$0xff]  ;;  %v196_v12 = vld [vmem:[%s690_s17 + $0xc8] sm:$0xff] }
  0x23   : > { %v324_v22 = vadd.f32 %v708_v19, %v285_v13  ;;  %v325_v23 = vadd.f32 %v708_v19, %v286_v14  ;;  %v326_v24 = vadd.f32 %v708_v19, %v287_v15  ;;  %v289_v25 = vmul.f32 %v696_v1, %v250_v16  ;;  %v197_v13 = vld [vmem:[%s690_s17 + $0xd0] sm:$0xff] }
  0x24   : > { %v616_v29 = vpack.c.bf16 %v321_v17, %v321_v17  ;;  %v617_v30 = vpack.c.bf16 %v322_v18, %v322_v18  ;;  %v618_v31 = vpack.c.bf16 %v323_v20, %v323_v20  ;;  %v327_v32 = vadd.f32 %v708_v19, %v288_v21  ;;  %v198_v18 = vld [vmem:[%s690_s17 + $0xd8] sm:$0xff]  ;;  %v199_v20 = vld [vmem:[%s690_s17 + $0xe0] sm:$0xff]  ;;  %v200_v21 = vld [vmem:[%s690_s17 + $0xe8] sm:$0xff] }
  0x25   : > { %v619_v36 = vpack.c.bf16 %v324_v22, %v324_v22  ;;  %v620_v37 = vpack.c.bf16 %v325_v23, %v325_v23  ;;  %v621_v38 = vpack.c.bf16 %v326_v24, %v326_v24  ;;  %v328_v39 = vadd.f32 %v708_v19, %v289_v25 }
  0x26   : > { %482 = vst.msk [vmem:[%s724_s25 + $0x20] sm:$0xf] %vm473_vm0, %v616_v29  ;;  %483 = vst.msk [vmem:[%s724_s25 + $0x24] sm:$0xf] %vm473_vm0, %v617_v30  ;;  %v622_v41 = vpack.c.bf16 %v327_v32, %v327_v32  ;;  %v219_v42 = vmax.f32 %v187_v26, 0.0  ;;  %v220_v43 = vmax.f32 %v188_v27, 0.0 }
  0x27   : > { %484 = vst.msk [vmem:[%s724_s25 + $0x28] sm:$0xf] %vm473_vm0, %v618_v31  ;;  %v221_v44 = vmax.f32 %v189_v28, 0.0  ;;  %485 = vst.msk [vmem:[%s724_s25 + $0x2c] sm:$0xf] %vm473_vm0, %v619_v36  ;;  %v623_v46 = vpack.c.bf16 %v328_v39, %v328_v39  ;;  %v222_v47 = vmax.f32 %v190_v33, 0.0 }
  0x28   : > { %486 = vst.msk [vmem:[%s724_s25 + $0x30] sm:$0xf] %vm473_vm0, %v620_v37  ;;  %487 = vst.msk [vmem:[%s724_s25 + $0x34] sm:$0xf] %vm473_vm0, %v621_v38  ;;  %v223_v48 = vmax.f32 %v191_v34, 0.0  ;;  %v224_v49 = vmax.f32 %v192_v35, 0.0 }
  0x29   : > { %488 = vst.msk [vmem:[%s724_s25 + $0x38] sm:$0xf] %vm473_vm0, %v622_v41  ;;  %v251_v50 = vmin.f32 %v219_v42, 255.0  ;;  %v252_v51 = vmin.f32 %v220_v43, 255.0  ;;  %v253_v52 = vmin.f32 %v221_v44, 255.0  ;;  %v225_v53 = vmax.f32 %v193_v40, 0.0 }
  0x2a   : > { %489 = vst.msk [vmem:[%s724_s25 + $0x3c] sm:$0xf] %vm473_vm0, %v623_v46  ;;  %v254_v54 = vmin.f32 %v222_v47, 255.0  ;;  %v255_v55 = vmin.f32 %v223_v48, 255.0  ;;  %v256_v56 = vmin.f32 %v224_v49, 255.0  ;;  %v226_v57 = vmax.f32 %v194_v45, 0.0 }
  0x2b   : > { %v290_v58 = vmul.f32 %v696_v1, %v251_v50  ;;  %v291_v59 = vmul.f32 %v696_v1, %v252_v51  ;;  %v292_v60 = vmul.f32 %v696_v1, %v253_v52  ;;  %v257_v61 = vmin.f32 %v225_v53, 255.0  ;;  %v201_v26 = vld [vmem:[%s690_s17 + $0xf0] sm:$0xff]  ;;  %v202_v31 = vld [vmem:[%s690_s17 + $0xf8] sm:$0xff] }
  0x2c   : > { %v293_v62 = vmul.f32 %v696_v1, %v254_v54  ;;  %v294_v63 = vmul.f32 %v696_v1, %v255_v55  ;;  %v295_v0 = vmul.f32 %v696_v1, %v256_v56  ;;  %v258_v2 = vmin.f32 %v226_v57, 255.0 }
  0x2d   : > { %v329_v3 = vadd.f32 %v708_v19, %v290_v58  ;;  %v330_v4 = vadd.f32 %v708_v19, %v291_v59  ;;  %v331_v5 = vadd.f32 %v708_v19, %v292_v60  ;;  %v296_v6 = vmul.f32 %v696_v1, %v257_v61 }
  0x2e   : > { %v332_v7 = vadd.f32 %v708_v19, %v293_v62  ;;  %v333_v8 = vadd.f32 %v708_v19, %v294_v63  ;;  %v334_v9 = vadd.f32 %v708_v19, %v295_v0  ;;  %v297_v10 = vmul.f32 %v696_v1, %v258_v2 }
  0x2f   : > { %v624_v14 = vpack.c.bf16 %v329_v3, %v329_v3  ;;  %v625_v15 = vpack.c.bf16 %v330_v4, %v330_v4  ;;  %v626_v16 = vpack.c.bf16 %v331_v5, %v331_v5  ;;  %v335_v17 = vadd.f32 %v708_v19, %v296_v6 }
  0x30   : > { %v627_v22 = vpack.c.bf16 %v332_v7, %v332_v7  ;;  %v628_v23 = vpack.c.bf16 %v333_v8, %v333_v8  ;;  %v629_v24 = vpack.c.bf16 %v334_v9, %v334_v9  ;;  %v336_v25 = vadd.f32 %v708_v19, %v297_v10 }
  0x31   : > { %490 = vst.msk [vmem:[%s724_s25 + $0x40] sm:$0xf] %vm473_vm0, %v624_v14  ;;  %491 = vst.msk [vmem:[%s724_s25 + $0x44] sm:$0xf] %vm473_vm0, %v625_v15  ;;  %v630_v27 = vpack.c.bf16 %v335_v17, %v335_v17  ;;  %v227_v28 = vmax.f32 %v195_v11, 0.0  ;;  %v228_v29 = vmax.f32 %v196_v12, 0.0 }
  0x32   : > { %492 = vst.msk [vmem:[%s724_s25 + $0x48] sm:$0xf] %vm473_vm0, %v626_v16  ;;  %v229_v30 = vmax.f32 %v197_v13, 0.0  ;;  %493 = vst.msk [vmem:[%s724_s25 + $0x4c] sm:$0xf] %vm473_vm0, %v627_v22  ;;  %v631_v32 = vpack.c.bf16 %v336_v25, %v336_v25  ;;  %v230_v33 = vmax.f32 %v198_v18, 0.0 }
  0x33   : > { %494 = vst.msk [vmem:[%s724_s25 + $0x50] sm:$0xf] %vm473_vm0, %v628_v23  ;;  %495 = vst.msk [vmem:[%s724_s25 + $0x54] sm:$0xf] %vm473_vm0, %v629_v24  ;;  %v231_v34 = vmax.f32 %v199_v20, 0.0  ;;  %v232_v35 = vmax.f32 %v200_v21, 0.0 }
  0x34   : > { %496 = vst.msk [vmem:[%s724_s25 + $0x58] sm:$0xf] %vm473_vm0, %v630_v27  ;;  %v259_v36 = vmin.f32 %v227_v28, 255.0  ;;  %v260_v37 = vmin.f32 %v228_v29, 255.0  ;;  %v261_v38 = vmin.f32 %v229_v30, 255.0  ;;  %v233_v39 = vmax.f32 %v201_v26, 0.0 }
  0x35   : > { %497 = vst.msk [vmem:[%s724_s25 + $0x5c] sm:$0xf] %vm473_vm0, %v631_v32  ;;  %v262_v40 = vmin.f32 %v230_v33, 255.0  ;;  %v263_v41 = vmin.f32 %v231_v34, 255.0  ;;  %v264_v42 = vmin.f32 %v232_v35, 255.0  ;;  %v234_v43 = vmax.f32 %v202_v31, 0.0 }
  0x36   : > { %v298_v44 = vmul.f32 %v696_v1, %v259_v36  ;;  %v299_v45 = vmul.f32 %v696_v1, %v260_v37  ;;  %v300_v46 = vmul.f32 %v696_v1, %v261_v38  ;;  %v265_v47 = vmin.f32 %v233_v39, 255.0 }
  0x37   : > { %v301_v48 = vmul.f32 %v696_v1, %v262_v40  ;;  %v302_v49 = vmul.f32 %v696_v1, %v263_v41  ;;  %v303_v50 = vmul.f32 %v696_v1, %v264_v42  ;;  %v266_v51 = vmin.f32 %v234_v43, 255.0 }
  0x38   : > { %v337_v52 = vadd.f32 %v708_v19, %v298_v44  ;;  %v338_v53 = vadd.f32 %v708_v19, %v299_v45  ;;  %v339_v54 = vadd.f32 %v708_v19, %v300_v46  ;;  %v304_v55 = vmul.f32 %v696_v1, %v265_v47 }
  0x39   : > { %v340_v56 = vadd.f32 %v708_v19, %v301_v48  ;;  %v341_v57 = vadd.f32 %v708_v19, %v302_v49  ;;  %v342_v58 = vadd.f32 %v708_v19, %v303_v50  ;;  %v305_v59 = vmul.f32 %v696_v1, %v266_v51 }
  0x3a   : > { %v632_v60 = vpack.c.bf16 %v337_v52, %v337_v52  ;;  %v633_v61 = vpack.c.bf16 %v338_v53, %v338_v53  ;;  %v634_v62 = vpack.c.bf16 %v339_v54, %v339_v54  ;;  %v343_v63 = vadd.f32 %v708_v19, %v304_v55 }
  0x3b   : > { %v635_v0 = vpack.c.bf16 %v340_v56, %v340_v56  ;;  %v636_v2 = vpack.c.bf16 %v341_v57, %v341_v57  ;;  %v637_v3 = vpack.c.bf16 %v342_v58, %v342_v58  ;;  %v344_v4 = vadd.f32 %v708_v19, %v305_v59 }
  0x3c   : > { %498 = vst.msk [vmem:[%s724_s25 + $0x60] sm:$0xf] %vm473_vm0, %v632_v60  ;;  %499 = vst.msk [vmem:[%s724_s25 + $0x64] sm:$0xf] %vm473_vm0, %v633_v61  ;;  %v638_v5 = vpack.c.bf16 %v343_v63, %v343_v63 }
  0x3d   : > { %500 = vst.msk [vmem:[%s724_s25 + $0x68] sm:$0xf] %vm473_vm0, %v634_v62  ;;  %501 = vst.msk [vmem:[%s724_s25 + $0x6c] sm:$0xf] %vm473_vm0, %v635_v0  ;;  %v639_v1 = vpack.c.bf16 %v344_v4, %v344_v4 }
  0x3e   : > { %502 = vst.msk [vmem:[%s724_s25 + $0x70] sm:$0xf] %vm473_vm0, %v636_v2  ;;  %503 = vst.msk [vmem:[%s724_s25 + $0x74] sm:$0xf] %vm473_vm0, %v637_v3 }
  0x3f   : > { %504 = vst.msk [vmem:[%s724_s25 + $0x78] sm:$0xf] %vm473_vm0, %v638_v5  ;;  %505 = vst.msk [vmem:[%s724_s25 + $0x7c] sm:$0xf] %vm473_vm0, %v639_v1 }
  0x40 PF: > { %s13_s12 = sadd.s32 1, %s654_s12  }
  0x41   : > { %p10_p4 = scmp.ge.s32.totalorder %s13_s12, 4  }
  0x43   :  { %12 = sbr.rel (!%p10_p4) target bundleno = 1 (0x1), region = 62 }

</bundles_post_ra>
